<compile_context>
chip_gen: v7x
topology: tpu7x:2x2x1
jax: 0.10.0
libtpu: 0.0.40
codegen_flags: <defaults>
</compile_context>

<pallas_src>
import jax
import jax.numpy as jnp
from jax.experimental import pallas as pl
from jax.experimental.pallas import tpu as pltpu

LANES = 128
ACC_ROWS = 32          # (32, 128) accumulator = 4 independent f32 vregs


def _vmem_capacity_bytes():
    """Best-effort physical-VMEM query; conservative fallback."""
    try:
        cap = getattr(pltpu.get_tpu_info(), "vmem_capacity_bytes", None)
        if isinstance(cap, int) and cap > 0:
            return cap
    except Exception:
        pass
    return 64 << 20        # assume the smallest (v7x per-TensorCore)


def _num_tensorcores():
    """Best-effort TensorCores-per-chip query; fall back to 1 (v5e/v6e)."""
    try:
        info = pltpu.get_tpu_info()
        for name in ("num_cores", "core_count", "num_tensorcores",
                     "tensorcore_count", "cores_per_chip"):
            v = getattr(info, name, None)
            if isinstance(v, int) and v >= 1:
                return min(v, 2)
    except Exception:
        pass
    return 1


def _tile_budget():
    """(max_tile_rows, vmem_limit_bytes) per TPU generation."""
    cap = _vmem_capacity_bytes()
    if cap >= (96 << 20):       # v5e / v6e: 128 MiB physical VMEM
        return 4096, 32 << 20   # 4 streams x 2 MiB x 2 buffers = 16 MiB
    return 2048, 24 << 20       # v7x: 64 MiB physical -> 8 MiB of inputs


def _round_up(x, m):
    return ((x + m - 1) // m) * m


def _make_kernel(tile_rows, acc_rows, tiles_per_shard, total_tiles, valid_rows):
    groups = tile_rows // acc_rows
    needs_mask = (total_tiles * tile_rows) != valid_rows
    last_blk = total_tiles - 1

    def fold(x):
        # (tile_rows,128) -> (groups, acc_rows, 128) splits only the leading
        # (sublane) axis: free reshape, then `groups-1` vreg adds into
        # acc_rows/8 independent accumulator vregs (keeps the VALU dependency
        # chain short -> off the critical path even at 3.2 TB/s HBM).
        return jnp.sum(x.reshape(groups, acc_rows, LANES), axis=0)

    def kernel(ir_ref, ii_ref, tr_ref, ti_ref, acc_ref):
        s = pl.program_id(0)
        t = pl.program_id(1)

        @pl.when(t == 0)
        def _():
            acc_ref[...] = jnp.zeros_like(acc_ref)

        # In-register upcast (no-op for f32; enables bf16 inputs at half the
        # HBM bytes without any wrapper-side cast).
        dr = ir_ref[...].astype(jnp.float32) - tr_ref[...].astype(jnp.float32)
        di = ii_ref[...].astype(jnp.float32) - ti_ref[...].astype(jnp.float32)
        sq = dr * dr + di * di                 # |input - target|^2, pure VPU

        if not needs_mask:
            acc_ref[...] += fold(sq)
        else:
            blk = s * tiles_per_shard + t
            is_boundary = blk == last_blk

            @pl.when(blk != last_blk)
            def _():
                acc_ref[...] += fold(sq)

            @pl.when(is_boundary)
            def _():
                # Boundary block: rows past the array end hold unspecified
                # data (we never zero-pad in HBM), so mask before summing.
                row = blk * tile_rows + jax.lax.broadcasted_iota(
                    jnp.int32, (tile_rows, LANES), 0)
                acc_ref[...] += fold(jnp.where(row < valid_rows, sq, 0.0))

    return kernel


def complex_rmse_loss(input_re, input_im, target_re, target_im):
    """sqrt(mean(|input - target|^2)) for complex tensors given as (re, im)."""
    assert input_re.shape == input_im.shape == target_re.shape == target_im.shape
    n_elems = int(input_re.size)          # true number of complex elements

    max_tile_rows, vmem_limit = _tile_budget()

    # ---- lane-dense (rows, 128) view of each operand (free when aligned) ---
    lane_pad = (-n_elems) % LANES
    rows = (n_elems + lane_pad) // LANES

    def prep(x):
        flat = x.reshape(-1)              # free
        if lane_pad:
            # TODO(synk): numel not a multiple of 128 still costs one padded
            # copy per operand; a manual-DMA (memory_space=pl.ANY) path would
            # remove it.  The padding is zeros on both input and target, so
            # it contributes exactly 0 to the sum.
            flat = jnp.pad(flat, (0, lane_pad))
        return flat.reshape(rows, LANES)  # free when lane_pad == 0

    ir, ii, tr, ti = (prep(x) for x in (input_re, input_im,
                                        target_re, target_im))

    # ---- tiling / sharding --------------------------------------------------
    acc_rows = ACC_ROWS if rows >= ACC_ROWS else 8
    tile_rows = min(max_tile_rows, _round_up(rows, acc_rows))
    total_tiles = pl.cdiv(rows, tile_rows)

    num_shards = _num_tensorcores()
    if num_shards > 1 and total_tiles % num_shards != 0:
        num_shards = 1                    # keep every grid block in range
    tiles_per_shard = total_tiles // num_shards

    in_spec = pl.BlockSpec((tile_rows, LANES),
                           lambda s, t: (s * tiles_per_shard + t, 0))
    out_spec = pl.BlockSpec((acc_rows, LANES), lambda s, t: (s, 0))

    kernel = _make_kernel(tile_rows, acc_rows, tiles_per_shard,
                          total_tiles, rows)

    partial = pl.pallas_call(
        kernel,
        out_shape=jax.ShapeDtypeStruct((num_shards * acc_rows, LANES),
                                       jnp.float32),
        grid_spec=pltpu.PrefetchScalarGridSpec(
            num_scalar_prefetch=0,
            grid=(num_shards, tiles_per_shard),
            in_specs=[in_spec, in_spec, in_spec, in_spec],
            out_specs=out_spec,
        ),
        compiler_params=pltpu.CompilerParams(
            # Shard axis is independent (2 TCs on v7x, a trivial 1-trip loop
            # elsewhere); the inner axis is the streaming reduction.
            dimension_semantics=("parallel", "arbitrary"),
            vmem_limit_bytes=vmem_limit,
        ),
    )(ir, ii, tr, ti)

    # Tiny epilogue: cross-lane sum of the (num_shards*acc_rows, 128) partial
    # sums, mean over the TRUE element count, sqrt.
    return jnp.sqrt(jnp.sum(partial, dtype=jnp.float32) / n_elems)


if __name__ == "__main__":
    key = jax.random.PRNGKey(0)
    k1, k2, k3, k4 = jax.random.split(key, 4)
    shape = (2, 4, 16, 16)  # NCHW complex tensor carried as (re, im)

    input_re = jax.random.normal(k1, shape, dtype=jnp.float32)
    input_im = jax.random.normal(k2, shape, dtype=jnp.float32)
    target_re = jax.random.normal(k3, shape, dtype=jnp.float32)
    target_im = jax.random.normal(k4, shape, dtype=jnp.float32)

    loss_fn = jax.jit(complex_rmse_loss)
    rmse = jax.block_until_ready(loss_fn(input_re, input_im,
                                         target_re, target_im))

    # Pure-JAX reference (same math as the torch module).
    diff_sq = (input_re - target_re) ** 2 + (input_im - target_im) ** 2
    ref = jnp.sqrt(jnp.mean(diff_sq))
    assert jnp.allclose(rmse, ref, rtol=1e-5, atol=1e-6), (rmse, ref)

    print("KERNEL_OK")
</pallas_src>

<mosaic_0001>
module attributes {stable_mosaic.version = 11 : i64} {
  func.func @kernel(%arg0: i32, %arg1: i32, %arg2: memref<16x128xf32, #tpu.memory_space<vmem>>, %arg3: memref<16x128xf32, #tpu.memory_space<vmem>>, %arg4: memref<16x128xf32, #tpu.memory_space<vmem>>, %arg5: memref<16x128xf32, #tpu.memory_space<vmem>>, %arg6: memref<8x128xf32, #tpu.memory_space<vmem>>) attributes {dimension_semantics = [#tpu.dimension_semantics<parallel>, #tpu.dimension_semantics<arbitrary>], iteration_bounds = array<i64: 1, 1>, scalar_prefetch = 0 : i64, scratch_operands = 0 : i64, tpu.core_type = #tpu.core_type<tc>, window_params = [{transform_indices = @transform_0, window_bounds = array<i64: 16, 128>}, {transform_indices = @transform_1, window_bounds = array<i64: 16, 128>}, {transform_indices = @transform_2, window_bounds = array<i64: 16, 128>}, {transform_indices = @transform_3, window_bounds = array<i64: 16, 128>}, {transform_indices = @transform_4, window_bounds = array<i64: 8, 128>}]} {
    %c0_i32 = arith.constant 0 : i32
    %0 = arith.cmpi eq, %arg1, %c0_i32 : i32
    %1 = arith.extui %0 : i1 to i32
    %c0_i32_0 = arith.constant 0 : i32
    %2 = arith.cmpi ne, %1, %c0_i32_0 : i32
    scf.if %2 {
      %cst_12 = arith.constant 0.000000e+00 : f32
      %17 = vector.broadcast %cst_12 : f32 to vector<8x128xf32>
      %c0_13 = arith.constant 0 : index
      %c0_14 = arith.constant 0 : index
      %18 = vector.load %arg6[%c0_13, %c0_14] : memref<8x128xf32, #tpu.memory_space<vmem>>, vector<8x128xf32>
      tpu.vector_store %arg6[%c0_13, %c0_14], %17 {strides = array<i32>} : memref<8x128xf32, #tpu.memory_space<vmem>>, vector<8x128xf32>,
    } else {
    }
    %c0 = arith.constant 0 : index
    %c0_1 = arith.constant 0 : index
    %3 = vector.load %arg2[%c0, %c0_1] : memref<16x128xf32, #tpu.memory_space<vmem>>, vector<16x128xf32>
    %c0_2 = arith.constant 0 : index
    %c0_3 = arith.constant 0 : index
    %4 = vector.load %arg4[%c0_2, %c0_3] : memref<16x128xf32, #tpu.memory_space<vmem>>, vector<16x128xf32>
    %5 = arith.subf %3, %4 : vector<16x128xf32>
    %c0_4 = arith.constant 0 : index
    %c0_5 = arith.constant 0 : index
    %6 = vector.load %arg3[%c0_4, %c0_5] : memref<16x128xf32, #tpu.memory_space<vmem>>, vector<16x128xf32>
    %c0_6 = arith.constant 0 : index
    %c0_7 = arith.constant 0 : index
    %7 = vector.load %arg5[%c0_6, %c0_7] : memref<16x128xf32, #tpu.memory_space<vmem>>, vector<16x128xf32>
    %8 = arith.subf %6, %7 : vector<16x128xf32>
    %9 = arith.mulf %5, %5 : vector<16x128xf32>
    %10 = arith.mulf %8, %8 : vector<16x128xf32>
    %11 = arith.addf %9, %10 : vector<16x128xf32>
    %c0_8 = arith.constant 0 : index
    %c0_9 = arith.constant 0 : index
    %12 = vector.load %arg6[%c0_8, %c0_9] : memref<8x128xf32, #tpu.memory_space<vmem>>, vector<8x128xf32>
    %13 = vector.shape_cast %11 : vector<16x128xf32> to vector<2x8x128xf32>
    %cst = arith.constant dense<0.000000e+00> : vector<8x128xf32>
    %14 = vector.multi_reduction <add>, %13, %cst [0] : vector<2x8x128xf32> to vector<8x128xf32>
    %15 = arith.addf %12, %14 : vector<8x128xf32>
    %c0_10 = arith.constant 0 : index
    %c0_11 = arith.constant 0 : index
    %16 = vector.load %arg6[%c0_10, %c0_11] : memref<8x128xf32, #tpu.memory_space<vmem>>, vector<8x128xf32>
    tpu.vector_store %arg6[%c0_10, %c0_11], %15 {strides = array<i32>} : memref<8x128xf32, #tpu.memory_space<vmem>>, vector<8x128xf32>,
    return
  }
  func.func @transform_0(%arg0: i32, %arg1: i32) -> (i32, i32) {
    %c1_i32 = arith.constant 1 : i32
    %0 = arith.muli %arg0, %c1_i32 : i32
    %1 = arith.addi %0, %arg1 : i32
    %c0_i32 = arith.constant 0 : i32
    %c0_i32_0 = arith.constant 0 : i32
    return %1, %c0_i32 : i32, i32
  }
  func.func @transform_1(%arg0: i32, %arg1: i32) -> (i32, i32) {
    %c1_i32 = arith.constant 1 : i32
    %0 = arith.muli %arg0, %c1_i32 : i32
    %1 = arith.addi %0, %arg1 : i32
    %c0_i32 = arith.constant 0 : i32
    %c0_i32_0 = arith.constant 0 : i32
    return %1, %c0_i32 : i32, i32
  }
  func.func @transform_2(%arg0: i32, %arg1: i32) -> (i32, i32) {
    %c1_i32 = arith.constant 1 : i32
    %0 = arith.muli %arg0, %c1_i32 : i32
    %1 = arith.addi %0, %arg1 : i32
    %c0_i32 = arith.constant 0 : i32
    %c0_i32_0 = arith.constant 0 : i32
    return %1, %c0_i32 : i32, i32
  }
  func.func @transform_3(%arg0: i32, %arg1: i32) -> (i32, i32) {
    %c1_i32 = arith.constant 1 : i32
    %0 = arith.muli %arg0, %c1_i32 : i32
    %1 = arith.addi %0, %arg1 : i32
    %c0_i32 = arith.constant 0 : i32
    %c0_i32_0 = arith.constant 0 : i32
    return %1, %c0_i32 : i32, i32
  }
  func.func @transform_4(%arg0: i32, %arg1: i32) -> (i32, i32) {
    %c0_i32 = arith.constant 0 : i32
    %c0_i32_0 = arith.constant 0 : i32
    return %arg0, %c0_i32 : i32, i32
  }
}

</mosaic_0001>

<bundles_post_ra>
// kernel: complex_rmse_loss.1
= control target key start
LH: loop header
LB: loop body
LE: loop exit
PB: predicated region body
PF: predicated region fallthrough
CT: control target
= control target key end

     0   :  { %s213_s0 = inlined_call_operand.vmem [shape: f32[16,128], index: 0, kind: input, shape index: {}]   ;;  %s214_s1 = inlined_call_operand.vmem [shape: f32[16,128], index: 1, kind: input, shape index: {}]   ;;  %s215_s2 = inlined_call_operand.vmem [shape: f32[16,128], index: 2, kind: input, shape index: {}]   ;;  %s216_s3 = inlined_call_operand.vmem [shape: f32[16,128], index: 3, kind: input, shape index: {}]   ;;  %s217_s4 = inlined_call_operand.vmem [shape: f32[8,128], index: 4, kind: output, shape index: {}]  }
   0x1   :  { %v110_v0 = vld [vmem:[%s213_s0] sm:$0xff]  ;;  %v111_v1 = vld [vmem:[%s213_s0 + $0x8] sm:$0xff] }
   0x2   :  { %v112_v2 = vld [vmem:[%s215_s2] sm:$0xff]  ;;  %v113_v3 = vld [vmem:[%s215_s2 + $0x8] sm:$0xff] }
   0x3   :  { %v114_v4 = vsub.f32 %v110_v0, %v112_v2  ;;  %v116_v5 = vld [vmem:[%s214_s1] sm:$0xff]  ;;  %v117_v6 = vld [vmem:[%s214_s1 + $0x8] sm:$0xff]  ;;  %v115_v7 = vsub.f32 %v111_v1, %v113_v3 }
   0x4   :  { %v118_v8 = vld [vmem:[%s216_s3] sm:$0xff]  ;;  %v119_v9 = vld [vmem:[%s216_s3 + $0x8] sm:$0xff] }
   0x5   :  { %v120_v10 = vsub.f32 %v116_v5, %v118_v8  ;;  %v121_v11 = vsub.f32 %v117_v6, %v119_v9  ;;  %v122_v12 = vmul.f32 %v114_v4, %v114_v4  ;;  %v123_v13 = vmul.f32 %v115_v7, %v115_v7 }
   0x7   :  { %v124_v14 = vmul.f32 %v120_v10, %v120_v10  ;;  %v125_v15 = vmul.f32 %v121_v11, %v121_v11 }
   0x9   :  { %v126_v16 = vadd.f32 %v124_v14, %v122_v12  ;;  %v127_v17 = vadd.f32 %v125_v15, %v123_v13 }
   0xb   :  { %v129_v18 = vadd.f32 %v127_v17, %v126_v16 }
   0xd   :  { %131 = vst [vmem:[%s217_s4] sm:$0xff] %v129_v18 }

</bundles_post_ra>
